<compile_context>
chip_gen: v7x
topology: tpu7x:2x2x1
jax: 0.10.0
libtpu: 0.0.40
codegen_flags: <defaults>
</compile_context>

<pallas_src>
import functools

import jax
import jax.numpy as jnp
from jax.experimental import pallas as pl
from jax.experimental.pallas import tpu as pltpu

EPS = 1e-15
MAX_LOGVAR = 10.0

LANE = 128
SUBLANE = 8


def _round_up(x, m):
    return (x + m - 1) // m * m


def _vgae_loss_kernel(zT_ref, mu_ref, logvar_ref,
                      idx_i_ref, idx_j_ref, sel_ref, w_ref,
                      out_ref, *, kl_scale):
    t = pl.program_id(0)

    # ---- Grid step 0: seed the (8, 128) output accumulator with the KL term.
    #      Padded mu/logvar entries are exactly zero -> 1 + 0 - 0 - exp(0) = 0,
    #      so the padded region contributes nothing to the sum.
    @pl.when(t == 0)
    def _init():
        mu = mu_ref[...]
        lv = jnp.minimum(logvar_ref[...], MAX_LOGVAR)
        kl_sum = jnp.sum(1.0 + lv - mu * mu - jnp.exp(lv))
        out_ref[...] = (jnp.zeros(out_ref.shape, jnp.float32)
                        + (-0.5 * kl_scale) * kl_sum)

    # ---- Edge tile: exact row gather via one-hot MXU matmuls, fused pos/neg BCE.
    zT = zT_ref[...]                                   # (D_pad, N_pad)
    n_pad = zT.shape[1]
    e_tile = idx_i_ref.shape[1]

    node_id = jax.lax.broadcasted_iota(jnp.int32, (n_pad, e_tile), 0)
    idx_i = idx_i_ref[...][0:1, :]                     # (1, E_tile)
    idx_j = idx_j_ref[...][0:1, :]
    oh_i = (node_id == idx_i).astype(jnp.float32)      # (N_pad, E_tile)
    oh_j = (node_id == idx_j).astype(jnp.float32)

    zi = jnp.dot(zT, oh_i, preferred_element_type=jnp.float32)   # (D_pad, E_tile)
    zj = jnp.dot(zT, oh_j, preferred_element_type=jnp.float32)
    logits = jnp.sum(zi * zj, axis=0, keepdims=True)              # (1, E_tile)

    p = jax.nn.sigmoid(logits)
    sel = sel_ref[...][0:1, :]       # 1.0 -> positive edge, 0.0 -> negative / padding
    w = w_ref[...][0:1, :]           # 1/E_pos, 1/E_neg, or 0.0 for padding
    prob = sel * p + (1.0 - sel) * (1.0 - p)           # matches torch: p vs (1 - p)
    tile_sum = jnp.sum(w * (-jnp.log(prob + EPS)))

    out_ref[...] = out_ref[...] + tile_sum


def vgae_loss(z, mu, logvar, pos_edge_index, neg_edge_index, *, edge_tile=128):
    """z, mu, logvar: (N, D) float. pos/neg_edge_index: (2, E) int."""
    assert edge_tile % LANE == 0
    z = jnp.asarray(z, jnp.float32)
    mu = jnp.asarray(mu, jnp.float32)
    logvar = jnp.asarray(logvar, jnp.float32)

    n, d = z.shape
    e_pos = int(pos_edge_index.shape[1])
    e_neg = int(neg_edge_index.shape[1])
    e_tot = e_pos + e_neg

    # Hardware-aligned zero padding.
    n_pad = _round_up(max(n, 1), LANE)
    d_pad = _round_up(max(d, 1), LANE)
    e_pad = _round_up(max(e_tot, 1), edge_tile)
    num_tiles = e_pad // edge_tile

    def pad2(a):
        return jnp.pad(a, ((0, n_pad - n), (0, d_pad - d)))

    zT_p = pad2(z).T                 # (d_pad, n_pad): nodes on the lane axis for the gather matmul
    mu_p, lv_p = pad2(mu), pad2(logvar)

    # Fused pos+neg edge list; padding edges point at node 0 but carry zero weight.
    idx = jnp.concatenate([jnp.asarray(pos_edge_index, jnp.int32),
                           jnp.asarray(neg_edge_index, jnp.int32)], axis=1)
    idx = jnp.pad(idx, ((0, 0), (0, e_pad - e_tot)))

    ar = jnp.arange(e_pad)
    sel = (ar < e_pos).astype(jnp.float32)
    w = jnp.where(ar < e_pos, 1.0 / e_pos,
                  jnp.where(ar < e_tot, 1.0 / e_neg, 0.0)).astype(jnp.float32)

    def rep8(row):                   # (e_pad,) -> (8, e_pad): sublane-aligned buffer
        return jnp.broadcast_to(row[None, :], (SUBLANE, e_pad))

    idx_i2, idx_j2 = rep8(idx[0]), rep8(idx[1])
    sel2, w2 = rep8(sel), rep8(w)

    kernel = functools.partial(_vgae_loss_kernel, kl_scale=1.0 / float(n * n))

    zT_spec = pl.BlockSpec((d_pad, n_pad), lambda t: (0, 0))
    nd_spec = pl.BlockSpec((n_pad, d_pad), lambda t: (0, 0))
    edge_spec = pl.BlockSpec((SUBLANE, edge_tile), lambda t: (0, t))
    out_spec = pl.BlockSpec((SUBLANE, LANE), lambda t: (0, 0))

    out = pl.pallas_call(
        kernel,
        out_shape=jax.ShapeDtypeStruct((SUBLANE, LANE), jnp.float32),
        grid=(num_tiles,),
        in_specs=[zT_spec, nd_spec, nd_spec,
                  edge_spec, edge_spec, edge_spec, edge_spec],
        out_specs=out_spec,
        compiler_params=pltpu.CompilerParams(
            dimension_semantics=("arbitrary",)),
    )(zT_p, mu_p, lv_p, idx_i2, idx_j2, sel2, w2)
    return out[0, 0]


def _reference_loss(z, mu, logvar, pos_edge_index, neg_edge_index):
    """Plain-JAX mirror of the PyTorch forward, for correctness checking."""
    def decoder(z, ei):
        return jax.nn.sigmoid(jnp.sum(z[ei[0]] * z[ei[1]], axis=1))
    pos_loss = -jnp.mean(jnp.log(decoder(z, pos_edge_index) + EPS))
    neg_loss = -jnp.mean(jnp.log(1.0 - decoder(z, neg_edge_index) + EPS))
    lv = jnp.minimum(logvar, MAX_LOGVAR)
    kl = -0.5 * jnp.mean(jnp.sum(1.0 + lv - mu ** 2 - jnp.exp(lv), axis=1))
    return pos_loss + neg_loss + kl / z.shape[0]


if __name__ == "__main__":
    key = jax.random.PRNGKey(0)
    N, D = 16, 32            # nodes, latent dim
    E_POS, E_NEG = 16, 16    # positive / negative edges

    k1, k2, k3, k4, k5 = jax.random.split(key, 5)
    z = jax.random.normal(k1, (N, D), dtype=jnp.float32)
    mu = jax.random.normal(k2, (N, D), dtype=jnp.float32) * 0.5
    logvar = jax.random.normal(k3, (N, D), dtype=jnp.float32) * 0.5
    pos_edge_index = jax.random.randint(k4, (2, E_POS), 0, N, dtype=jnp.int32)
    neg_edge_index = jax.random.randint(k5, (2, E_NEG), 0, N, dtype=jnp.int32)

    loss = vgae_loss(z, mu, logvar, pos_edge_index, neg_edge_index)
    loss = jax.block_until_ready(loss)

    ref = _reference_loss(z, mu, logvar, pos_edge_index, neg_edge_index)
    assert bool(jnp.isfinite(loss)), loss
    assert jnp.allclose(loss, ref, rtol=1e-3, atol=1e-3), (loss, ref)

    print("KERNEL_OK")
</pallas_src>

<mosaic_0001>
module attributes {stable_mosaic.version = 11 : i64} {
  func.func @_vgae_loss_kernel(%arg0: i32, %arg1: memref<128x128xf32, #tpu.memory_space<vmem>>, %arg2: memref<128x128xf32, #tpu.memory_space<vmem>>, %arg3: memref<128x128xf32, #tpu.memory_space<vmem>>, %arg4: memref<8x128xi32, #tpu.memory_space<vmem>>, %arg5: memref<8x128xi32, #tpu.memory_space<vmem>>, %arg6: memref<8x128xf32, #tpu.memory_space<vmem>>, %arg7: memref<8x128xf32, #tpu.memory_space<vmem>>, %arg8: memref<8x128xf32, #tpu.memory_space<vmem>>) attributes {dimension_semantics = [#tpu.dimension_semantics<arbitrary>], iteration_bounds = array<i64: 1>, scalar_prefetch = 0 : i64, scratch_operands = 0 : i64, tpu.core_type = #tpu.core_type<tc>, window_params = [{pipeline_mode = #tpu.pipeline_mode<synchronous>, transform_indices = @transform_0, window_bounds = array<i64: 128, 128>}, {pipeline_mode = #tpu.pipeline_mode<synchronous>, transform_indices = @transform_1, window_bounds = array<i64: 128, 128>}, {pipeline_mode = #tpu.pipeline_mode<synchronous>, transform_indices = @transform_2, window_bounds = array<i64: 128, 128>}, {transform_indices = @transform_3, window_bounds = array<i64: 8, 128>}, {transform_indices = @transform_4, window_bounds = array<i64: 8, 128>}, {transform_indices = @transform_5, window_bounds = array<i64: 8, 128>}, {transform_indices = @transform_6, window_bounds = array<i64: 8, 128>}, {pipeline_mode = #tpu.pipeline_mode<synchronous>, transform_indices = @transform_7, window_bounds = array<i64: 8, 128>}]} {
    %c0_i32 = arith.constant 0 : i32
    %0 = arith.cmpi eq, %arg0, %c0_i32 : i32
    %1 = arith.extui %0 : i1 to i32
    %c0_i32_0 = arith.constant 0 : i32
    %2 = arith.cmpi ne, %1, %c0_i32_0 : i32
    scf.if %2 {
      %c0_22 = arith.constant 0 : index
      %c0_23 = arith.constant 0 : index
      %52 = vector.load %arg2[%c0_22, %c0_23] : memref<128x128xf32, #tpu.memory_space<vmem>>, vector<128x128xf32>
      %c0_24 = arith.constant 0 : index
      %c0_25 = arith.constant 0 : index
      %53 = vector.load %arg3[%c0_24, %c0_25] : memref<128x128xf32, #tpu.memory_space<vmem>>, vector<128x128xf32>
      %cst_26 = arith.constant 1.000000e+01 : f32
      %54 = vector.broadcast %cst_26 : f32 to vector<128x128xf32>
      %55 = arith.minimumf %53, %54 : vector<128x128xf32>
      %cst_27 = arith.constant 1.000000e+00 : f32
      %56 = vector.broadcast %cst_27 : f32 to vector<128x128xf32>
      %57 = arith.addf %56, %55 : vector<128x128xf32>
      %58 = arith.mulf %52, %52 : vector<128x128xf32>
      %59 = arith.subf %57, %58 : vector<128x128xf32>
      %60 = math.exp %55 : vector<128x128xf32>
      %61 = arith.subf %59, %60 : vector<128x128xf32>
      %62 = vector.shape_cast %61 : vector<128x128xf32> to vector<1x128x128xf32>
      %cst_28 = arith.constant dense<0.000000e+00> : vector<1xf32>
      %63 = vector.multi_reduction <add>, %62, %cst_28 [1, 2] : vector<1x128x128xf32> to vector<1xf32>
      %64 = vector.shape_cast %63 : vector<1xf32> to vector<1x1x1xf32>
      %65 = vector.extract %64[0, 0, 0] : f32 from vector<1x1x1xf32>
      %cst_29 = arith.constant 0.000000e+00 : f32
      %66 = vector.broadcast %cst_29 : f32 to vector<8x128xf32>
      %cst_30 = arith.constant -0.001953125 : f32
      %67 = arith.mulf %cst_30, %65 : f32
      %68 = vector.broadcast %67 : f32 to vector<8x128xf32>
      %69 = arith.addf %66, %68 : vector<8x128xf32>
      %c0_31 = arith.constant 0 : index
      %c0_32 = arith.constant 0 : index
      %70 = vector.load %arg8[%c0_31, %c0_32] : memref<8x128xf32, #tpu.memory_space<vmem>>, vector<8x128xf32>
      tpu.vector_store %arg8[%c0_31, %c0_32], %69 {strides = array<i32>} : memref<8x128xf32, #tpu.memory_space<vmem>>, vector<8x128xf32>,
    } else {
    }
    %c0 = arith.constant 0 : index
    %c0_1 = arith.constant 0 : index
    %3 = vector.load %arg1[%c0, %c0_1] : memref<128x128xf32, #tpu.memory_space<vmem>>, vector<128x128xf32>
    %4 = tpu.iota {dimensions = array<i32: 0>} : vector<128x128xi32>
    %c0_2 = arith.constant 0 : index
    %c0_3 = arith.constant 0 : index
    %5 = vector.load %arg4[%c0_2, %c0_3] : memref<8x128xi32, #tpu.memory_space<vmem>>, vector<8x128xi32>
    %6 = vector.extract_strided_slice %5 {offsets = [0, 0], sizes = [1, 128], strides = [1, 1]} : vector<8x128xi32> to vector<1x128xi32>
    %c0_4 = arith.constant 0 : index
    %c0_5 = arith.constant 0 : index
    %7 = vector.load %arg5[%c0_4, %c0_5] : memref<8x128xi32, #tpu.memory_space<vmem>>, vector<8x128xi32>
    %8 = vector.extract_strided_slice %7 {offsets = [0, 0], sizes = [1, 128], strides = [1, 1]} : vector<8x128xi32> to vector<1x128xi32>
    %9 = vector.broadcast %6 : vector<1x128xi32> to vector<128x128xi32>
    %10 = arith.cmpi eq, %4, %9 : vector<128x128xi32>
    %11 = arith.extui %10 : vector<128x128xi1> to vector<128x128xi32>
    %12 = arith.sitofp %11 : vector<128x128xi32> to vector<128x128xf32>
    %13 = vector.broadcast %8 : vector<1x128xi32> to vector<128x128xi32>
    %14 = arith.cmpi eq, %4, %13 : vector<128x128xi32>
    %15 = arith.extui %14 : vector<128x128xi1> to vector<128x128xi32>
    %16 = arith.sitofp %15 : vector<128x128xi32> to vector<128x128xf32>
    %cst = arith.constant dense<0.000000e+00> : vector<128x128xf32>
    %17 = tpu.matmul %3, %12, %cst {dimension_numbers = #tpu.dot_dimension_numbers<[1], [0], [0], [1], [0, 0, 1, 1], [], []>} : vector<128x128xf32>, vector<128x128xf32>, vector<128x128xf32> -> vector<128x128xf32>
    %cst_6 = arith.constant dense<0.000000e+00> : vector<128x128xf32>
    %18 = tpu.matmul %3, %16, %cst_6 {dimension_numbers = #tpu.dot_dimension_numbers<[1], [0], [0], [1], [0, 0, 1, 1], [], []>} : vector<128x128xf32>, vector<128x128xf32>, vector<128x128xf32> -> vector<128x128xf32>
    %19 = arith.mulf %17, %18 : vector<128x128xf32>
    %cst_7 = arith.constant dense<0.000000e+00> : vector<128xf32>
    %20 = vector.multi_reduction <add>, %19, %cst_7 [0] : vector<128x128xf32> to vector<128xf32>
    %21 = vector.shape_cast %20 : vector<128xf32> to vector<1x128xf32>
    %22 = arith.negf %21 : vector<1x128xf32>
    %23 = math.exp %22 : vector<1x128xf32>
    %cst_8 = arith.constant 1.000000e+00 : f32
    %24 = vector.broadcast %cst_8 : f32 to vector<1x128xf32>
    %25 = arith.addf %24, %23 : vector<1x128xf32>
    %26 = arith.divf %24, %25 : vector<1x128xf32>
    %c0_9 = arith.constant 0 : index
    %c0_10 = arith.constant 0 : index
    %27 = vector.load %arg6[%c0_9, %c0_10] : memref<8x128xf32, #tpu.memory_space<vmem>>, vector<8x128xf32>
    %28 = vector.extract_strided_slice %27 {offsets = [0, 0], sizes = [1, 128], strides = [1, 1]} : vector<8x128xf32> to vector<1x128xf32>
    %c0_11 = arith.constant 0 : index
    %c0_12 = arith.constant 0 : index
    %29 = vector.load %arg7[%c0_11, %c0_12] : memref<8x128xf32, #tpu.memory_space<vmem>>, vector<8x128xf32>
    %30 = vector.extract_strided_slice %29 {offsets = [0, 0], sizes = [1, 128], strides = [1, 1]} : vector<8x128xf32> to vector<1x128xf32>
    %31 = arith.mulf %28, %26 : vector<1x128xf32>
    %cst_13 = arith.constant 1.000000e+00 : f32
    %32 = vector.broadcast %cst_13 : f32 to vector<1x128xf32>
    %33 = arith.subf %32, %28 : vector<1x128xf32>
    %cst_14 = arith.constant 1.000000e+00 : f32
    %34 = vector.broadcast %cst_14 : f32 to vector<1x128xf32>
    %35 = arith.subf %34, %26 : vector<1x128xf32>
    %36 = arith.mulf %33, %35 : vector<1x128xf32>
    %37 = arith.addf %31, %36 : vector<1x128xf32>
    %cst_15 = arith.constant 1.000000e-15 : f32
    %38 = vector.broadcast %cst_15 : f32 to vector<1x128xf32>
    %39 = arith.addf %37, %38 : vector<1x128xf32>
    %40 = math.log %39 : vector<1x128xf32>
    %cst_16 = arith.constant 0.000000e+00 : f32
    %41 = vector.broadcast %cst_16 : f32 to vector<1x128xf32>
    %42 = arith.subf %41, %40 : vector<1x128xf32>
    %43 = arith.mulf %30, %42 : vector<1x128xf32>
    %44 = vector.shape_cast %43 : vector<1x128xf32> to vector<1x1x128xf32>
    %cst_17 = arith.constant dense<0.000000e+00> : vector<1xf32>
    %45 = vector.multi_reduction <add>, %44, %cst_17 [1, 2] : vector<1x1x128xf32> to vector<1xf32>
    %46 = vector.shape_cast %45 : vector<1xf32> to vector<1x1x1xf32>
    %47 = vector.extract %46[0, 0, 0] : f32 from vector<1x1x1xf32>
    %c0_18 = arith.constant 0 : index
    %c0_19 = arith.constant 0 : index
    %48 = vector.load %arg8[%c0_18, %c0_19] : memref<8x128xf32, #tpu.memory_space<vmem>>, vector<8x128xf32>
    %49 = vector.broadcast %47 : f32 to vector<8x128xf32>
    %50 = arith.addf %48, %49 : vector<8x128xf32>
    %c0_20 = arith.constant 0 : index
    %c0_21 = arith.constant 0 : index
    %51 = vector.load %arg8[%c0_20, %c0_21] : memref<8x128xf32, #tpu.memory_space<vmem>>, vector<8x128xf32>
    tpu.vector_store %arg8[%c0_20, %c0_21], %50 {strides = array<i32>} : memref<8x128xf32, #tpu.memory_space<vmem>>, vector<8x128xf32>,
    return
  }
  func.func @transform_0(%arg0: i32) -> (i32, i32) {
    %c0_i32 = arith.constant 0 : i32
    %c0_i32_0 = arith.constant 0 : i32
    %c0_i32_1 = arith.constant 0 : i32
    return %c0_i32, %c0_i32_0 : i32, i32
  }
  func.func @transform_1(%arg0: i32) -> (i32, i32) {
    %c0_i32 = arith.constant 0 : i32
    %c0_i32_0 = arith.constant 0 : i32
    %c0_i32_1 = arith.constant 0 : i32
    return %c0_i32, %c0_i32_0 : i32, i32
  }
  func.func @transform_2(%arg0: i32) -> (i32, i32) {
    %c0_i32 = arith.constant 0 : i32
    %c0_i32_0 = arith.constant 0 : i32
    %c0_i32_1 = arith.constant 0 : i32
    return %c0_i32, %c0_i32_0 : i32, i32
  }
  func.func @transform_3(%arg0: i32) -> (i32, i32) {
    %c0_i32 = arith.constant 0 : i32
    %c0_i32_0 = arith.constant 0 : i32
    return %c0_i32, %arg0 : i32, i32
  }
  func.func @transform_4(%arg0: i32) -> (i32, i32) {
    %c0_i32 = arith.constant 0 : i32
    %c0_i32_0 = arith.constant 0 : i32
    return %c0_i32, %arg0 : i32, i32
  }
  func.func @transform_5(%arg0: i32) -> (i32, i32) {
    %c0_i32 = arith.constant 0 : i32
    %c0_i32_0 = arith.constant 0 : i32
    return %c0_i32, %arg0 : i32, i32
  }
  func.func @transform_6(%arg0: i32) -> (i32, i32) {
    %c0_i32 = arith.constant 0 : i32
    %c0_i32_0 = arith.constant 0 : i32
    return %c0_i32, %arg0 : i32, i32
  }
  func.func @transform_7(%arg0: i32) -> (i32, i32) {
    %c0_i32 = arith.constant 0 : i32
    %c0_i32_0 = arith.constant 0 : i32
    %c0_i32_1 = arith.constant 0 : i32
    return %c0_i32, %c0_i32_0 : i32, i32
  }
}

</mosaic_0001>

<bundles_post_ra>
// kernel: tpu_custom_call.1
= control target key start
LH: loop header
LB: loop body
LE: loop exit
PB: predicated region body
PF: predicated region fallthrough
CT: control target
= control target key end

     0   :  { %12 = vsyncpa [#allocation3], 0  ;;  %s1608_s0 = inlined_call_operand.hbm [shape: f32[128,128], index: 0, kind: input, shape index: {}]   ;;  %s1609_s1 = inlined_call_operand.hbm [shape: f32[128,128], index: 1, kind: input, shape index: {}]   ;;  %s1610_s2 = inlined_call_operand.hbm [shape: f32[128,128], index: 2, kind: input, shape index: {}]   ;;  %s1611_s3 = inlined_call_operand.vmem [shape: s32[8,128], index: 3, kind: input, shape index: {}]   ;;  %s1612_s4 = inlined_call_operand.hbm [shape: s32[8,128], index: 4, kind: input, shape index: {}]   ;;  %s1613_s5 = inlined_call_operand.vmem [shape: f32[8,128], index: 5, kind: input, shape index: {}]   ;;  %s1614_s6 = inlined_call_operand.hbm [shape: f32[8,128], index: 6, kind: input, shape index: {}]   ;;  %s1615_s7 = inlined_call_operand.hbm [shape: f32[8,128], index: 7, kind: output, shape index: {}]  }
   0x1   :  { %13 = vsyncpa [#allocation6], 0 }
   0x2   :  { %14 = vsyncpa [#allocation9], 0 }
   0x3   :  { %15 = vsyncpa [#allocation4], 0  ;;  %s1279_s24 = smov [#allocation5]   ;;  %s1280_s26 = smov [#allocation8]  }
   0x4   :  { %s33_s25 = sshll.u32 %s1279_s24, 4  ;;  %s60_s27 = sshll.u32 %s1280_s26, 4  ;;  %s34_s25 = int_to_ptr.vmem [resolvable:$true] %s33_s25  ;;  %s61_s27 = int_to_ptr.vmem [resolvable:$true] %s60_s27 }
   0x5   :  { %s1139_s30 = scalar_lea.hbm %s1609_s1, 2048 }
   0x6   :  { %p1140_p0 = scmp.ne.s32.totalorder %s1609_s1, %s1139_s30  ;;  %p1143_p1 = scmp.lt.u32.totalorder %s1139_s30, %s1609_s1 }
   0x8   :  { %p1145_p2 = pnand %p1143_p1, %p1140_p0 }
   0xa   :  { %1148 = shalt.err (!%p1145_p2)
}
   0xb   :  { %s1149_s12 = scalar_lea.vmem %s34_s25, 2048  ;;  %p1154_p4 = scmp.lt.s32.totalorder %s34_s25, %s34_s25 }
   0xc   :  { %p1150_p3 = scmp.ne.s32.totalorder %s34_s25, %s1149_s12  ;;  %p1155_p5 = scmp.lt.s32.totalorder %s1149_s12, %s1149_s12 }
   0xe   :  { %p1156_p6 = por %p1155_p5, %p1154_p4 }
  0x10   :  { %p1157_p7 = pnand %p1156_p6, %p1150_p3 }
  0x12   :  { %1160 = shalt.err (!%p1157_p7)
}
  0x13   :  { %s1281_s13 = smov 128   ;;  %s1282_s14 = smov 8  }
  0x14   :  { %39 = dma.hbm_to_vmem [thread:$0]  %s1609_s1, 2048, %s34_s25, [#allocation6], %s1281_s13, %s1281_s13, %s1282_s14  }
  0x15   :  { %s1161_s19 = scalar_lea.hbm %s1612_s4, 128 }
  0x16   :  { %p1162_p8 = scmp.ne.s32.totalorder %s1612_s4, %s1161_s19  ;;  %p1165_p9 = scmp.lt.u32.totalorder %s1161_s19, %s1612_s4 }
  0x18   :  { %p1167_p10 = pnand %p1165_p9, %p1162_p8 }
  0x1a   :  { %1170 = shalt.err (!%p1167_p10)
}
  0x1b   :  { %s1171_s24 = scalar_lea.vmem %s61_s27, 128  ;;  %p1176_p12 = scmp.lt.s32.totalorder %s61_s27, %s61_s27 }
  0x1c   :  { %p1172_p11 = scmp.ne.s32.totalorder %s61_s27, %s1171_s24  ;;  %p1177_p13 = scmp.lt.s32.totalorder %s1171_s24, %s1171_s24 }
  0x1e   :  { %p1178_p0 = por %p1177_p13, %p1176_p12 }
  0x20   :  { %p1179_p1 = pnand %p1178_p0, %p1172_p11 }
  0x22   :  { %1182 = shalt.err (!%p1179_p1)
}
  0x23   :  { %63 = dma.hbm_to_vmem [thread:$0]  %s1612_s4, 128, %s61_s27, [#allocation9]  }
  0x24   :  { %s1283_s26 = smov [#allocation2]   ;;  %s1284_s29 = smov [#allocation7]  }
  0x25   :  { %s21_s28 = sshll.u32 %s1283_s26, 4  ;;  %s45_s30 = sshll.u32 %s1284_s29, 4  ;;  %s22_s28 = int_to_ptr.vmem [resolvable:$true] %s21_s28  ;;  %s1355_s30 = int_to_ptr.vmem [resolvable:$true] %s45_s30 }
  0x26   :  { %s1183_s10 = scalar_lea.hbm %s1608_s0, 2048 }
  0x27   :  { %p1184_p2 = scmp.ne.s32.totalorder %s1608_s0, %s1183_s10  ;;  %p1187_p3 = scmp.lt.u32.totalorder %s1183_s10, %s1608_s0 }
  0x29   :  { %p1189_p4 = pnand %p1187_p3, %p1184_p2 }
  0x2b   :  { %1192 = shalt.err (!%p1189_p4)
}
  0x2c   :  { %s1193_s4 = scalar_lea.vmem %s22_s28, 2048  ;;  %p1198_p6 = scmp.lt.s32.totalorder %s22_s28, %s22_s28 }
  0x2d   :  { %p1194_p5 = scmp.ne.s32.totalorder %s22_s28, %s1193_s4  ;;  %p1199_p7 = scmp.lt.s32.totalorder %s1193_s4, %s1193_s4 }
  0x2f   :  { %p1200_p8 = por %p1199_p7, %p1198_p6 }
  0x31   :  { %p1201_p9 = pnand %p1200_p8, %p1194_p5 }
  0x33   :  { %1204 = shalt.err (!%p1201_p9)
}
  0x34   :  { %27 = dma.hbm_to_vmem [thread:$0]  %s1608_s0, 2048, %s22_s28, [#allocation3], %s1281_s13, %s1281_s13, %s1282_s14  }
  0x35   :  { %s1205_s20 = scalar_lea.hbm %s1610_s2, 2048 }
  0x36   :  { %p1206_p10 = scmp.ne.s32.totalorder %s1610_s2, %s1205_s20  ;;  %p1209_p11 = scmp.lt.u32.totalorder %s1205_s20, %s1610_s2 }
  0x38   :  { %p1211_p12 = pnand %p1209_p11, %p1206_p10 }
  0x3a   :  { %1214 = shalt.err (!%p1211_p12)
}
  0x3b   :  { %s1215_s1 = scalar_lea.vmem %s1355_s30, 2048  ;;  %p1220_p0 = scmp.lt.s32.totalorder %s1355_s30, %s1355_s30 }
  0x3c   :  { %p1216_p13 = scmp.ne.s32.totalorder %s1355_s30, %s1215_s1  ;;  %p1221_p1 = scmp.lt.s32.totalorder %s1215_s1, %s1215_s1 }
  0x3e   :  { %p1222_p2 = por %p1221_p1, %p1220_p0 }
  0x40   :  { %p1223_p3 = pnand %p1222_p2, %p1216_p13 }
  0x42   :  { %1226 = shalt.err (!%p1223_p3)
}
  0x43   :  { %51 = dma.hbm_to_vmem [thread:$0]  %s1610_s2, 2048, %s1355_s30, [#allocation6], %s1281_s13, %s1281_s13, %s1282_s14  }
  0x44   :  { %s1285_s26 = smov [#allocation10]   ;;  %s1227_s9 = scalar_lea.hbm %s1614_s6, 128 }
  0x45   :  { %s72_s28 = sshll.u32 %s1285_s26, 4  ;;  %p1228_p4 = scmp.ne.s32.totalorder %s1614_s6, %s1227_s9  ;;  %s73_s28 = int_to_ptr.vmem [resolvable:$true] %s72_s28 }
  0x46   :  { %p1231_p5 = scmp.lt.u32.totalorder %s1227_s9, %s1614_s6 }
  0x48   :  { %p1233_p6 = pnand %p1231_p5, %p1228_p4 }
  0x4a   :  { %1236 = shalt.err (!%p1233_p6)
}
  0x4b   :  { %s1237_s16 = scalar_lea.vmem %s73_s28, 128  ;;  %p1242_p8 = scmp.lt.s32.totalorder %s73_s28, %s73_s28 }
  0x4c   :  { %p1238_p7 = scmp.ne.s32.totalorder %s73_s28, %s1237_s16  ;;  %p1243_p9 = scmp.lt.s32.totalorder %s1237_s16, %s1237_s16 }
  0x4e   :  { %p1244_p10 = por %p1243_p9, %p1242_p8 }
  0x50   :  { %p1245_p11 = pnand %p1244_p10, %p1238_p7 }
  0x52   :  { %1248 = shalt.err (!%p1245_p11)
}
  0x53   :  { %75 = dma.hbm_to_vmem [thread:$0]  %s1614_s6, 128, %s73_s28, [#allocation9]  }
  0x54   :  { %1271 = dma.done.wait [#allocation3], 2048  }
  0x55   :  { %1272 = vsyncadd [#allocation3], 4294965248 }
  0x56   :  { %1273 = dma.done.wait [#allocation6], 4096  }
  0x57   :  { %1274 = vsyncadd [#allocation6], 4294963200 }
  0x58   :  { %1275 = dma.done.wait [#allocation9], 256  }
  0x59   :  { %1276 = vsyncadd [#allocation9], 4294967040  ;;  %v283_v0 = vlaneseq  ;;  %v300_v4 = vld [vmem:[%s1611_s3] sm:$0xff]  ;;  %v1286_v13 = vmov 1.0|1.0   ;;  %v268_v32 = vld [vmem:[#allocation2 + $0x8] sm:$0xff] }
  0x5a   :  { %v301_v5 = vld [vmem:[#allocation8] sm:$0xff]  ;;  %v269_v33 = vld [vmem:[#allocation2 + $0x10] sm:$0xff]  ;;  %v270_v34 = vld [vmem:[#allocation2 + $0x18] sm:$0xff]  ;;  %s1287_s27 = smov [#allocation11]  }
  0x5b   :  { %v1404_v1 = vshrl.u32 %v283_v0, 7  ;;  %v267_v12 = vld [vmem:[#allocation2] sm:$0xff]  ;;  %v272_v36 = vld [vmem:[#allocation2 + $0x28] sm:$0xff]  ;;  %v273_v37 = vld [vmem:[#allocation2 + $0x30] sm:$0xff]  ;;  %s772_s17 = sshll.u32 %s1287_s27, 4  ;;  %s773_s17 = int_to_ptr.vmem [resolvable:$true] %s772_s17 }
  0x5c   :  { %944 = vmatprep.mubr.f32.mxu0 %v267_v12  ;;  %1000 = vmatprep.mubr.f32.mxu1 %v267_v12  ;;  %v271_v35 = vld [vmem:[#allocation2 + $0x20] sm:$0xff]  ;;  %v274_v38 = vld [vmem:[#allocation2 + $0x38] sm:$0xff]  ;;  %v276_v40 = vld [vmem:[#allocation2 + $0x48] sm:$0xff]  ;;  %s1249_s19 = scalar_lea.vmem %s773_s17, 128  ;;  %p1254_p13 = scmp.lt.s32.totalorder %s773_s17, %s773_s17 }
  0x5d   :  { %v304_v2 = vsub.s32 0, %v1404_v1  ;;  %v285_v3 = vadd.s32 8, %v1404_v1  ;;  %v286_v6 = vadd.s32 16, %v1404_v1  ;;  %v287_v7 = vadd.s32 24, %v1404_v1  ;;  %v275_v39 = vld [vmem:[#allocation2 + $0x40] sm:$0xff]  ;;  %v277_v41 = vld [vmem:[#allocation2 + $0x50] sm:$0xff]  ;;  %p1250_p12 = scmp.ne.s32.totalorder %s773_s17, %s1249_s19  ;;  %p1255_p0 = scmp.lt.s32.totalorder %s1249_s19, %s1249_s19 }
  0x5e   :  { %v288_v10 = vadd.s32 32, %v1404_v1  ;;  %v289_v11 = vadd.s32 40, %v1404_v1  ;;  %v290_v14 = vadd.s32 48, %v1404_v1  ;;  %v291_v15 = vadd.s32 56, %v1404_v1  ;;  %v278_v42 = vld [vmem:[#allocation2 + $0x58] sm:$0xff]  ;;  %v279_v43 = vld [vmem:[#allocation2 + $0x60] sm:$0xff] }
  0x5f   :  { %v1413_v8 = vrot.slane %v300_v4, %v304_v2  ;;  %v1415_v9 = vrot.slane %v301_v5, %v304_v2  ;;  %v292_v18 = vadd.s32 64, %v1404_v1  ;;  %v293_v19 = vadd.s32 72, %v1404_v1  ;;  %v280_v44 = vld [vmem:[#allocation2 + $0x68] sm:$0xff]  ;;  %v281_v45 = vld [vmem:[#allocation2 + $0x70] sm:$0xff]  ;;  %v282_v46 = vld [vmem:[#allocation2 + $0x78] sm:$0xff]  ;;  %p1256_p1 = por %p1255_p0, %p1254_p13 }
  0x60   :  { %v294_v22 = vadd.s32 80, %v1404_v1  ;;  %v295_v23 = vadd.s32 88, %v1404_v1  ;;  %v296_v26 = vadd.s32 96, %v1404_v1  ;;  %v297_v27 = vadd.s32 104, %v1404_v1  ;;  %v111_v47 = vld [vmem:[#allocation7] sm:$0xff]  ;;  %v112_v48 = vld [vmem:[#allocation7 + $0x8] sm:$0xff] }
  0x61   :  { %vm306_vm0 = vcmp.eq.s32.totalorder %v1404_v1, %v1413_v8  ;;  %vm307_vm1 = vcmp.eq.s32.totalorder %v285_v3, %v1413_v8  ;;  %vm358_vm2 = vcmp.eq.s32.totalorder %v1404_v1, %v1415_v9  ;;  %vm359_vm3 = vcmp.eq.s32.totalorder %v285_v3, %v1415_v9  ;;  %v113_v50 = vld [vmem:[#allocation7 + $0x10] sm:$0xff]  ;;  %v114_v52 = vld [vmem:[#allocation7 + $0x18] sm:$0xff]  ;;  %v115_v55 = vld [vmem:[#allocation7 + $0x20] sm:$0xff]  ;;  %p1257_p2 = pnand %p1256_p1, %p1250_p12 }
  0x62   :  { %vm1024_vm4 = vmpackc.low %vm307_vm1, %vm306_vm0  ;;  %vm308_vm5 = vcmp.eq.s32.totalorder %v286_v6, %v1413_v8  ;;  %vm309_vm6 = vcmp.eq.s32.totalorder %v287_v7, %v1413_v8  ;;  %vm360_vm7 = vcmp.eq.s32.totalorder %v286_v6, %v1415_v9  ;;  %vm361_vm8 = vcmp.eq.s32.totalorder %v287_v7, %v1415_v9  ;;  %v116_v58 = vld [vmem:[#allocation7 + $0x28] sm:$0xff]  ;;  %v1563_v61 = vld [vmem:[#allocation7 + $0x30] sm:$0xff] }
  0x63   :  { %1025 = vmatprep.subr.msk.bf16.mxu0 %vm1024_vm4, %v1286_v13  ;;  %vm1056_vm9 = vmpackc.low %vm359_vm3, %vm358_vm2  ;;  %vm310_vm10 = vcmp.eq.s32.totalorder %v288_v10, %v1413_v8  ;;  %vm311_vm11 = vcmp.eq.s32.totalorder %v289_v11, %v1413_v8  ;;  %vm362_vm13 = vcmp.eq.s32.totalorder %v288_v10, %v1415_v9  ;;  %vm363_vm14 = vcmp.eq.s32.totalorder %v289_v11, %v1415_v9  ;;  %v95_v62 = vld [vmem:[#allocation5] sm:$0xff]  ;;  %v96_v63 = vld [vmem:[#allocation5 + $0x8] sm:$0xff] }
  0x64   :  { %1057 = vmatprep.subr.msk.bf16.mxu1 %vm1056_vm9, %v1286_v13  ;;  %1027 = vmatpush3.bf16.msk.msra.mxu0 %vm1024_vm4, %v1286_v13  ;;  %vm1028_vm12 = vmpackc.low %vm309_vm6, %vm308_vm5  ;;  %vm312_vm2 = vcmp.eq.s32.totalorder %v290_v14, %v1413_v8  ;;  %vm313_vm3 = vcmp.eq.s32.totalorder %v291_v15, %v1413_v8  ;;  %vm364_vm4 = vcmp.eq.s32.totalorder %v290_v14, %v1415_v9  ;;  %v298_v30 = vadd.s32 112, %v1404_v1  ;;  %v1565_v2 = vld [vmem:[#allocation7 + $0x38] sm:$0xff]  ;;  %v97_v5 = vld [vmem:[#allocation5 + $0x10] sm:$0xff] }
  0x65   :  { %1059 = vmatpush3.bf16.msk.msra.mxu1 %vm1056_vm9, %v1286_v13  ;;  %1029 = vmatprep.subr.msk.bf16.mxu0 %vm1028_vm12, %v1286_v13  ;;  %vm1060_vm15 = vmpackc.low %vm361_vm8, %vm360_vm7  ;;  %vm365_vm5 = vcmp.eq.s32.totalorder %v291_v15, %v1415_v9  ;;  %vm314_vm8 = vcmp.eq.s32.totalorder %v292_v18, %v1413_v8  ;;  %vm315_vm9 = vcmp.eq.s32.totalorder %v293_v19, %v1413_v8  ;;  %v299_v31 = vadd.s32 120, %v1404_v1  ;;  %v1568_v6 = vld [vmem:[#allocation7 + $0x40] sm:$0xff]  ;;  %v98_v14 = vld [vmem:[#allocation5 + $0x18] sm:$0xff] }
  0x66   :  { %1061 = vmatprep.subr.msk.bf16.mxu1 %vm1060_vm15, %v1286_v13  ;;  %vm1445_vm0 = vmpackc.low %vm311_vm11, %vm310_vm10  ;;  %vm366_vm10 = vcmp.eq.s32.totalorder %v292_v18, %v1415_v9  ;;  %vm367_vm11 = vcmp.eq.s32.totalorder %v293_v19, %v1415_v9  ;;  %v127_v49 = vmin.f32 %v111_v47, 10.0  ;;  %v128_v51 = vmin.f32 %v112_v48, 10.0  ;;  %v1574_v20 = vld [vmem:[#allocation7 + $0x50] sm:$0xff]  ;;  %v99_v24 = vld [vmem:[#allocation5 + $0x20] sm:$0xff] }
  0x67   :  { %vm1449_vm1 = vmpackc.low %vm363_vm14, %vm362_vm13  ;;  %vm316_vm14 = vcmp.eq.s32.totalorder %v294_v22, %v1413_v8  ;;  %v129_v53 = vmin.f32 %v113_v50, 10.0  ;;  %v130_v57 = vmin.f32 %v114_v52, 10.0  ;;  %v131_v59 = vmin.f32 %v115_v55, 10.0  ;;  %v102_v48 = vld [vmem:[#allocation5 + $0x38] sm:$0xff] }
  0x68   :  { %1031 = vmatpush3.bf16.msk.msra.mxu0 %vm1028_vm12, %v1286_v13  ;;  %vm1467_vm6 = vmpackc.low %vm313_vm3, %vm312_vm2  ;;  %v191_v54 = vmul.f32 1.442695, %v127_v49  ;;  %v193_v56 = vmul.f32 1.442695, %v128_v51  ;;  %v132_v0 = vmin.f32 %v116_v58, 10.0  ;;  %v133_v4 = vmin.f32 %v1563_v61, 10.0 }
  0x69   :  { %1063 = vmatpush3.bf16.msk.msra.mxu1 %vm1060_vm15, %v1286_v13  ;;  %1033 = vmatprep.subr.msk.bf16.mxu0 %vm1445_vm0, %v1286_v13  ;;  %vm1471_vm7 = vmpackc.low %vm365_vm5, %vm364_vm4  ;;  %vm317_vm15 = vcmp.eq.s32.totalorder %v295_v23, %v1413_v8  ;;  %vm318_vm4 = vcmp.eq.s32.totalorder %v296_v26, %v1413_v8  ;;  %vm319_vm5 = vcmp.eq.s32.totalorder %v297_v27, %v1413_v8  ;;  %v195_v60 = vmul.f32 1.442695, %v129_v53  ;;  %v103_v58 = vld [vmem:[#allocation5 + $0x40] sm:$0xff]  ;;  %v1589_v61 = vld [vmem:[#allocation7 + $0x78] sm:$0xff] }
  0x6a   :  { %1065 = vmatprep.subr.msk.bf16.mxu1 %vm1449_vm1, %v1286_v13  ;;  %vm1493_vm12 = vmpackc.low %vm315_vm9, %vm314_vm8  ;;  %1101 = vpow2.f32 %v191_v54  ;;  %v197_v1 = vmul.f32 1.442695, %v130_v57  ;;  %v199_v3 = vmul.f32 1.442695, %v131_v59  ;;  %v143_v7 = vadd.f32 1.0, %v127_v49 }
  0x6b   :  { %vm1497_vm13 = vmpackc.low %vm367_vm11, %vm366_vm10  ;;  %vm320_vm10 = vcmp.eq.s32.totalorder %v298_v30, %v1413_v8  ;;  %vm321_vm11 = vcmp.eq.s32.totalorder %v299_v31, %v1413_v8  ;;  %1103 = vpow2.f32 %v193_v56  ;;  %v144_v8 = vadd.f32 1.0, %v128_v51 }
  0x6c   :  { %1035 = vmatpush3.bf16.msk.msra.mxu0 %vm1445_vm0, %v1286_v13  ;;  %vm368_vm0 = vcmp.eq.s32.totalorder %v294_v22, %v1415_v9  ;;  %vm1519_vm2 = vmpackc.low %vm317_vm15, %vm316_vm14  ;;  %1105 = vpow2.f32 %v195_v60  ;;  %v160_v10 = vmul.f32 %v96_v63, %v96_v63  ;;  %v134_v11 = vmin.f32 %v1565_v2, 10.0 }
  0x6d   :  { %1067 = vmatpush3.bf16.msk.msra.mxu1 %vm1449_vm1, %v1286_v13  ;;  %1037 = vmatprep.subr.msk.bf16.mxu0 %vm1467_vm6, %v1286_v13  ;;  %vm369_vm1 = vcmp.eq.s32.totalorder %v295_v23, %v1415_v9  ;;  %vm1048_vm8 = vmpackc.low %vm319_vm5, %vm318_vm4  ;;  %1107 = vpow2.f32 %v197_v1  ;;  %v201_v12 = vmul.f32 1.442695, %v132_v0  ;;  %v135_v15 = vmin.f32 %v1568_v6, 10.0 }
  0x6e   :  { %1069 = vmatprep.subr.msk.bf16.mxu1 %vm1471_vm7, %v1286_v13  ;;  %vm1523_vm3 = vmpackc.low %vm369_vm1, %vm368_vm0  ;;  %1109 = vpow2.f32 %v199_v3  ;;  %v145_v16 = vadd.f32 1.0, %v129_v53  ;;  %v161_v17 = vmul.f32 %v97_v5, %v97_v5  ;;  %v203_v18 = vmul.f32 1.442695, %v133_v4  ;;  %v1586_v53 = vld [vmem:[#allocation7 + $0x70] sm:$0xff]  ;;  %v104_v3 = vld [vmem:[#allocation5 + $0x48] sm:$0xff] }
  0x6f   :  { %vm1052_vm14 = vmpackc.low %vm321_vm11, %vm320_vm10  ;;  %v176_v22 = vsub.f32 %v144_v8, %v160_v10  ;;  %1111 = vpow2.f32 %v201_v12  ;;  %v146_v28 = vadd.f32 1.0, %v130_v57  ;;  %v162_v29 = vmul.f32 %v98_v14, %v98_v14 }
  0x70   :  { %1039 = vmatpush3.bf16.msk.msra.mxu0 %vm1467_vm6, %v1286_v13  ;;  %vm370_vm6 = vcmp.eq.s32.totalorder %v296_v26, %v1415_v9  ;;  %v205_v26 = vmul.f32 1.442695, %v134_v11  ;;  %1113 = vpow2.f32 %v203_v18  ;;  %v149_v54 = vadd.f32 1.0, %v133_v4 }
  0x71   :  { %1071 = vmatpush3.bf16.msk.msra.mxu1 %vm1471_vm7, %v1286_v13  ;;  %1041 = vmatprep.subr.msk.bf16.mxu0 %vm1493_vm12, %v1286_v13  ;;  %vm371_vm7 = vcmp.eq.s32.totalorder %v297_v27, %v1415_v9  ;;  %v1577_v27 = vld [vmem:[#allocation7 + $0x58] sm:$0xff]  ;;  %v166_v63 = vmul.f32 %v102_v48, %v102_v48  ;;  %v141_v5 = vmin.f32 %v1586_v53, 10.0  ;;  %v151_v6 = vadd.f32 1.0, %v135_v15 }
  0x72   :  { %1073 = vmatprep.subr.msk.bf16.mxu1 %vm1497_vm13, %v1286_v13  ;;  %vm1080_vm9 = vmpackc.low %vm371_vm7, %vm370_vm6  ;;  %1115 = vpow2.f32 %v205_v26  ;;  %v142_v14 = vmin.f32 %v1589_v61, 10.0  ;;  %vm751_vm0 = vcmask 1040384  }
  0x74   :  { %1043 = vmatpush3.bf16.msk.msra.mxu0 %vm1493_vm12, %v1286_v13  ;;  %vm372_vm12 = vcmp.eq.s32.totalorder %v298_v30, %v1415_v9  ;;  %v1102_v19 = vpop.eup %1101  ;;  %v100_v30 = vld [vmem:[#allocation5 + $0x28] sm:$0xff] }
  0x75   :  { %1075 = vmatpush3.bf16.msk.msra.mxu1 %vm1497_vm13, %v1286_v13  ;;  %1045 = vmatprep.subr.msk.bf16.mxu0 %vm1519_vm2, %v1286_v13  ;;  %vm373_vm13 = vcmp.eq.s32.totalorder %v299_v31, %v1415_v9  ;;  %v159_v9 = vmul.f32 %v95_v62, %v95_v62  ;;  %v1104_v23 = vpop.eup %1103  ;;  %v137_v31 = vmin.f32 %v1574_v20, 10.0  ;;  %v150_v62 = vadd.f32 1.0, %v134_v11 }
  0x76   :  { %1077 = vmatprep.subr.msk.bf16.mxu1 %vm1523_vm3, %v1286_v13  ;;  %vm1084_vm15 = vmpackc.low %vm373_vm13, %vm372_vm12 }
  0x77   :  { %v175_v21 = vsub.f32 %v143_v7, %v159_v9  ;;  %v211_v50 = vmul.f32 1.442695, %v137_v31  ;;  %v167_v7 = vmul.f32 %v103_v58, %v103_v58  ;;  %v182_v18 = vsub.f32 %v150_v62, %v166_v63 }
  0x78   :  { %1047 = vmatpush3.bf16.msk.msra.mxu0 %vm1519_vm2, %v1286_v13 }
  0x79   :  { %1079 = vmatpush3.bf16.msk.msra.mxu1 %vm1523_vm3, %v1286_v13  ;;  %1049 = vmatprep.subr.msk.bf16.mxu0 %vm1048_vm8, %v1286_v13 }
  0x7a   :  { %1081 = vmatprep.subr.msk.bf16.mxu1 %vm1080_vm9, %v1286_v13 }
  0x7c   :  { %1051 = vmatpush3.bf16.msk.msra.mxu0 %vm1048_vm8, %v1286_v13 }
  0x7d   :  { %1083 = vmatpush3.bf16.msk.msra.mxu1 %vm1080_vm9, %v1286_v13  ;;  %1053 = vmatprep.subr.msk.bf16.mxu0 %vm1052_vm14, %v1286_v13 }
  0x7e   :  { %1085 = vmatprep.subr.msk.bf16.mxu1 %vm1084_vm15, %v1286_v13 }
  0x80   :  { %1055 = vmatpush3.bf16.msk.msra.mxu0 %vm1052_vm14, %v1286_v13 }
  0x81   :  { %1087 = vmatpush3.bf16.msk.msra.mxu1 %vm1084_vm15, %v1286_v13  ;;  %v1571_v13 = vld [vmem:[#allocation7 + $0x48] sm:$0xff] }
  0x82   :  { %v136_v25 = vmin.f32 %v1571_v13, 10.0  ;;  %v105_v13 = vld [vmem:[#allocation5 + $0x50] sm:$0xff] }
  0x83   :  { %945 = vmatmul.mubr.f32.vlgmr.msra.gmra.mrb[0].mxu0 %v268_v32  ;;  %v169_v26 = vmul.f32 %v105_v13, %v105_v13 }
  0x84   :  { %1001 = vmatmul.mubr.f32.vlgmr.msra.gmra.mrb[0].mxu1 %v268_v32  ;;  %947 = vmatprep.mubr.f32.mxu0 %v269_v33  ;;  %v177_v32 = vsub.f32 %v145_v16, %v161_v17  ;;  %v152_v16 = vadd.f32 1.0, %v136_v25  ;;  %v168_v17 = vmul.f32 %v104_v3, %v104_v3 }
  0x85   :  { %1003 = vmatprep.mubr.f32.mxu1 %v269_v33  ;;  %v207_v33 = vmul.f32 1.442695, %v135_v15  ;;  %v153_v15 = vadd.f32 1.0, %v137_v31  ;;  %v109_v31 = vld [vmem:[#allocation5 + $0x70] sm:$0xff] }
  0x86   :  { %v173_v53 = vmul.f32 %v109_v31, %v109_v31 }
  0x87   :  { %948 = vmatmul.mubr.f32.gmra.mrb[2].mxu0 %v270_v34  ;;  %1117 = vpow2.f32 %v207_v33  ;;  %v108_v33 = vld [vmem:[#allocation5 + $0x68] sm:$0xff] }
  0x88   :  { %1004 = vmatmul.mubr.f32.gmra.mrb[2].mxu1 %v270_v34  ;;  %950 = vmatprep.mubr.f32.mxu0 %v271_v35  ;;  %v1106_v34 = vpop.eup %1105 }
  0x89   :  { %1006 = vmatprep.mubr.f32.mxu1 %v271_v35  ;;  %v1580_v35 = vld [vmem:[#allocation7 + $0x60] sm:$0xff]  ;;  %v1108_v47 = vpop.eup %1107  ;;  %v225_v51 = vsub.f32 %v177_v32, %v1106_v34 }
  0x8a   :  { %v139_v49 = vmin.f32 %v1580_v35, 10.0  ;;  %v1110_v52 = vpop.eup %1109  ;;  %v184_v35 = vsub.f32 %v152_v16, %v168_v17 }
  0x8b   :  { %951 = vmatmul.mubr.f32.gmra.mrb[4].mxu0 %v272_v36  ;;  %v1112_v2 = vpop.eup %1111 }
  0x8c   :  { %1007 = vmatmul.mubr.f32.gmra.mrb[4].mxu1 %v272_v36  ;;  %953 = vmatprep.mubr.f32.mxu0 %v273_v37  ;;  %v147_v36 = vadd.f32 1.0, %v131_v59  ;;  %v215_v4 = vmul.f32 1.442695, %v139_v49  ;;  %v1114_v12 = vpop.eup %1113 }
  0x8d   :  { %1009 = vmatprep.mubr.f32.mxu1 %v273_v37  ;;  %v163_v37 = vmul.f32 %v99_v24, %v99_v24  ;;  %v107_v24 = vld [vmem:[#allocation5 + $0x60] sm:$0xff] }
  0x8f   :  { %954 = vmatmul.mubr.f32.gmra.mrb[6].mxu0 %v274_v38  ;;  %v179_v56 = vsub.f32 %v147_v36, %v163_v37 }
  0x90   :  { %1010 = vmatmul.mubr.f32.gmra.mrb[6].mxu1 %v274_v38  ;;  %956 = vmatprep.mubr.f32.mxu0 %v275_v39  ;;  %v223_v38 = vsub.f32 %v175_v21, %v1102_v19  ;;  %v1116_v21 = vpop.eup %1115 }
  0x91   :  { %1012 = vmatprep.mubr.f32.mxu1 %v275_v39  ;;  %v224_v39 = vsub.f32 %v176_v22, %v1104_v23  ;;  %v227_v9 = vsub.f32 %v179_v56, %v1110_v52  ;;  %v106_v22 = vld [vmem:[#allocation5 + $0x58] sm:$0xff]  ;;  %v219_v23 = vmul.f32 1.442695, %v141_v5  ;;  %v230_v36 = vsub.f32 %v182_v18, %v1116_v21 }
  0x92   :  { %v170_v34 = vmul.f32 %v106_v22, %v106_v22 }
  0x93   :  { %957 = vmatmul.mubr.f32.gmra.mrb[8].mxu0 %v276_v40  ;;  %v239_v57 = vadd.f32 %v224_v39, %v223_v38  ;;  %v171_v39 = vmul.f32 %v107_v24, %v107_v24 }
  0x94   :  { %1013 = vmatmul.mubr.f32.gmra.mrb[8].mxu1 %v276_v40  ;;  %959 = vmatprep.mubr.f32.mxu0 %v277_v41  ;;  %v101_v40 = vld [vmem:[#allocation5 + $0x30] sm:$0xff] }
  0x95   :  { %1015 = vmatprep.mubr.f32.mxu1 %v277_v41  ;;  %v138_v41 = vmin.f32 %v1577_v27, 10.0  ;;  %v165_v55 = vmul.f32 %v101_v40, %v101_v40  ;;  %v240_v10 = vadd.f32 %v239_v57, %v225_v51  ;;  %v183_v27 = vsub.f32 %v151_v6, %v167_v7 }
  0x96   :  { %v155_v40 = vadd.f32 1.0, %v139_v49  ;;  %v158_v49 = vadd.f32 1.0, %v142_v14 }
  0x97   :  { %960 = vmatmul.mubr.f32.gmra.mrb[10].mxu0 %v278_v42  ;;  %v213_v60 = vmul.f32 1.442695, %v138_v41  ;;  %v181_v8 = vsub.f32 %v149_v54, %v165_v55  ;;  %v154_v32 = vadd.f32 1.0, %v138_v41  ;;  %v157_v54 = vadd.f32 1.0, %v141_v5 }
  0x98   :  { %1016 = vmatmul.mubr.f32.gmra.mrb[10].mxu1 %v278_v42  ;;  %962 = vmatprep.mubr.f32.mxu0 %v279_v43  ;;  %v209_v42 = vmul.f32 1.442695, %v136_v25  ;;  %v221_v25 = vmul.f32 1.442695, %v142_v14  ;;  %v187_v55 = vsub.f32 %v155_v40, %v171_v39 }
  0x99   :  { %1018 = vmatprep.mubr.f32.mxu1 %v279_v43  ;;  %v1583_v43 = vld [vmem:[#allocation7 + $0x68] sm:$0xff]  ;;  %v186_v48 = vsub.f32 %v154_v32, %v170_v34 }
  0x9a   :  { %v140_v59 = vmin.f32 %v1583_v43, 10.0  ;;  %1119 = vpow2.f32 %v209_v42  ;;  %v185_v42 = vsub.f32 %v153_v15, %v169_v26 }
  0x9b   :  { %963 = vmatmul.mubr.f32.gmra.mrb[12].mxu0 %v280_v44  ;;  %1121 = vpow2.f32 %v211_v50 }
  0x9c   :  { %1019 = vmatmul.mubr.f32.gmra.mrb[12].mxu1 %v280_v44  ;;  %965 = vmatprep.mubr.f32.mxu0 %v281_v45  ;;  %v148_v44 = vadd.f32 1.0, %v132_v0  ;;  %1123 = vpow2.f32 %v213_v60  ;;  %v217_v11 = vmul.f32 1.442695, %v140_v59  ;;  %v156_v41 = vadd.f32 1.0, %v140_v59 }
  0x9d   :  { %1021 = vmatprep.mubr.f32.mxu1 %v281_v45  ;;  %v164_v45 = vmul.f32 %v100_v30, %v100_v30  ;;  %1125 = vpow2.f32 %v215_v4  ;;  %v1118_v30 = vpop.eup %1117 }
  0x9e   :  { %1127 = vpow2.f32 %v217_v11  ;;  %v231_v43 = vsub.f32 %v183_v27, %v1118_v30 }
  0x9f   :  { %966 = vmatmul.mubr.f32.gmra.mrb[14].mxu0 %v282_v46  ;;  %v180_v0 = vsub.f32 %v148_v44, %v164_v45  ;;  %1129 = vpow2.f32 %v219_v23 }
  0xa0   :  { %1022 = vmatmul.mubr.f32.gmra.mrb[14].mxu1 %v282_v46  ;;  %v178_v46 = vsub.f32 %v146_v28, %v162_v29  ;;  %v229_v28 = vsub.f32 %v181_v8, %v1114_v12  ;;  %1131 = vpow2.f32 %v221_v25 }
  0xa1   :  { %v228_v19 = vsub.f32 %v180_v0, %v1112_v2 }
  0xa2   :  { %v226_v1 = vsub.f32 %v178_v46, %v1108_v47  ;;  %v172_v46 = vmul.f32 %v108_v33, %v108_v33  ;;  %v110_v47 = vld [vmem:[#allocation5 + $0x78] sm:$0xff] }
  0xa3   :  { %v174_v60 = vmul.f32 %v110_v47, %v110_v47 }
  0xa4   :  { %v241_v20 = vadd.f32 %v240_v10, %v226_v1  ;;  %v1120_v38 = vpop.eup %1119  ;;  %v188_v61 = vsub.f32 %v156_v41, %v172_v46  ;;  %v189_v1 = vsub.f32 %v157_v54, %v173_v53 }
  0xa5   :  { %v1122_v45 = vpop.eup %1121  ;;  %v232_v50 = vsub.f32 %v184_v35, %v1120_v38  ;;  %v190_v6 = vsub.f32 %v158_v49, %v174_v60 }
  0xa6   :  { %v242_v29 = vadd.f32 %v241_v20, %v227_v9  ;;  %v1124_v52 = vpop.eup %1123  ;;  %v233_v56 = vsub.f32 %v185_v42, %v1122_v45 }
  0xa7   :  { %v1126_v58 = vpop.eup %1125  ;;  %v234_v62 = vsub.f32 %v186_v48, %v1124_v52 }
  0xa8   :  { %v243_v37 = vadd.f32 %v242_v29, %v228_v19  ;;  %v1128_v0 = vpop.eup %1127  ;;  %v235_v2 = vsub.f32 %v187_v55, %v1126_v58 }
  0xa9   :  { %v1130_v59 = vpop.eup %1129  ;;  %v236_v4 = vsub.f32 %v188_v61, %v1128_v0 }
  0xaa   :  { %v244_v44 = vadd.f32 %v243_v37, %v229_v28  ;;  %v1132_v8 = vpop.eup %1131  ;;  %v237_v9 = vsub.f32 %v189_v1, %v1130_v59 }
  0xab   :  { %v238_v10 = vsub.f32 %v190_v6, %v1132_v8 }
  0xac   :  { %v245_v51 = vadd.f32 %v244_v44, %v230_v36 }
  0xae   :  { %v246_v57 = vadd.f32 %v245_v51, %v231_v43 }
  0xb0   :  { %v247_v63 = vadd.f32 %v246_v57, %v232_v50 }
  0xb2   :  { %v248_v3 = vadd.f32 %v247_v63, %v233_v56 }
  0xb4   :  { %v249_v7 = vadd.f32 %v248_v3, %v234_v62 }
  0xb6   :  { %v250_v5 = vadd.f32 %v249_v7, %v235_v2 }
  0xb8   :  { %v251_v12 = vadd.f32 %v250_v5, %v236_v4 }
  0xba   :  { %v252_v13 = vadd.f32 %v251_v12, %v237_v9 }
  0xbc   :  { %v253_v16 = vadd.f32 %v252_v13, %v238_v10 }
  0xbe   :  { %254 = vadd.xlane.f32.xlu0 %v253_v16 }
 0x156   :  { %v946_v14 = vpop.f32.mrb[0].mxu0 }
 0x157   :  { %v1002_v11 = vpop.f32.mrb[0].mxu1  ;;  %v472_v17 = vpop.f32.mrb[1].mxu0 }
 0x158   :  { %v697_v18 = vmul.f32 %v1002_v11, %v946_v14  ;;  %v617_v19 = vpop.f32.mrb[1].mxu1 }
 0x159   :  { %v696_v20 = vmul.f32 %v617_v19, %v472_v17 }
 0x15a   :  { %v949_v21 = vpop.f32.mrb[2].mxu0 }
 0x15b   :  { %v712_v22 = vadd.f32 %v697_v18, %v696_v20  ;;  %v1005_v15 = vpop.f32.mrb[2].mxu1  ;;  %v482_v23 = vpop.f32.mrb[3].mxu0 }
 0x15c   :  { %v699_v24 = vmul.f32 %v1005_v15, %v949_v21  ;;  %v627_v26 = vpop.f32.mrb[3].mxu1  ;;  %v739_v15 = vld [vmem:[%s1613_s5] sm:$0xff] }
 0x15d   :  { %v698_v27 = vmul.f32 %v627_v26, %v482_v23  ;;  %v742_v23 = vsub.f32 1.0, %v739_v15 }
 0x15e   :  { %v952_v28 = vpop.f32.mrb[4].mxu0 }
 0x15f   :  { %v713_v29 = vadd.f32 %v712_v22, %v698_v27  ;;  %v1008_v30 = vpop.f32.mrb[4].mxu1  ;;  %v492_v32 = vpop.f32.mrb[5].mxu0 }
 0x160   :  { %v701_v25 = vmul.f32 %v1008_v30, %v952_v28  ;;  %v637_v33 = vpop.f32.mrb[5].mxu1 }
 0x161   :  { %v700_v34 = vmul.f32 %v637_v33, %v492_v32  ;;  %v714_v35 = vadd.f32 %v713_v29, %v699_v24  ;;  %v740_v33 = vld [vmem:[#allocation10] sm:$0xff] }
 0x162   :  { %v955_v36 = vpop.f32.mrb[6].mxu0 }
 0x163   :  { %v715_v37 = vadd.f32 %v714_v35, %v700_v34  ;;  %v1011_v38 = vpop.f32.mrb[6].mxu1  ;;  %v502_v39 = vpop.f32.mrb[7].mxu0 }
 0x164   :  { %v703_v31 = vmul.f32 %v1011_v38, %v955_v36  ;;  %v647_v40 = vpop.f32.mrb[7].mxu1 }
 0x165   :  { %v702_v42 = vmul.f32 %v647_v40, %v502_v39  ;;  %v716_v43 = vadd.f32 %v715_v37, %v701_v25  ;;  %v255_v37 = vpop.xlane.xlu0 %254 }
 0x166   :  { %v958_v44 = vpop.f32.mrb[8].mxu0  ;;  %v256_v38 = vrot.slane %v255_v37, 4 }
 0x167   :  { %v717_v45 = vadd.f32 %v716_v43, %v702_v42  ;;  %v1014_v46 = vpop.f32.mrb[8].mxu1  ;;  %v512_v47 = vpop.f32.mrb[9].mxu0 }
 0x168   :  { %v705_v41 = vmul.f32 %v1014_v46, %v958_v44  ;;  %v657_v48 = vpop.f32.mrb[9].mxu1  ;;  %v257_v39 = vadd.f32 %v256_v38, %v255_v37 }
 0x169   :  { %v704_v50 = vmul.f32 %v657_v48, %v512_v47  ;;  %v718_v51 = vadd.f32 %v717_v45, %v703_v31 }
 0x16a   :  { %v961_v52 = vpop.f32.mrb[10].mxu0  ;;  %v258_v31 = vrot.slane %v257_v39, 2 }
 0x16b   :  { %v719_v53 = vadd.f32 %v718_v51, %v704_v50  ;;  %v1017_v54 = vpop.f32.mrb[10].mxu1  ;;  %v522_v55 = vpop.f32.mrb[11].mxu0 }
 0x16c   :  { %v707_v56 = vmul.f32 %v1017_v54, %v961_v52  ;;  %v667_v57 = vpop.f32.mrb[11].mxu1  ;;  %v259_v40 = vadd.f32 %v258_v31, %v257_v39 }
 0x16d   :  { %v706_v58 = vmul.f32 %v667_v57, %v522_v55  ;;  %v720_v60 = vadd.f32 %v719_v53, %v705_v41 }
 0x16e   :  { %v964_v49 = vpop.f32.mrb[12].mxu0  ;;  %v260_v42 = vrot.slane %v259_v40, 1 }
 0x16f   :  { %v721_v61 = vadd.f32 %v720_v60, %v706_v58  ;;  %v1020_v62 = vpop.f32.mrb[12].mxu1  ;;  %v532_v63 = vpop.f32.mrb[13].mxu0 }
 0x170   :  { %v709_v0 = vmul.f32 %v1020_v62, %v964_v49  ;;  %v677_v1 = vpop.f32.mrb[13].mxu1  ;;  %v261_v43 = vadd.f32 %v260_v42, %v259_v40 }
 0x171   :  { %v708_v2 = vmul.f32 %v677_v1, %v532_v63  ;;  %v722_v3 = vadd.f32 %v721_v61, %v707_v56 }
 0x172   :  { %v967_v59 = vpop.f32.mrb[14].mxu0  ;;  %1088 = vpush %v261_v43 }
 0x173   :  { %v723_v6 = vadd.f32 %v722_v3, %v708_v2  ;;  %v1023_v4 = vpop.f32.mrb[14].mxu1  ;;  %v542_v7 = vpop.f32.mrb[15].mxu0 }
 0x174   :  { %v711_v8 = vmul.f32 %v1023_v4, %v967_v59  ;;  %v687_v9 = vpop.f32.mrb[15].mxu1 }
 0x175   :  { %v710_v5 = vmul.f32 %v687_v9, %v542_v7  ;;  %v724_v10 = vadd.f32 %v723_v6, %v709_v0 }
 0x177   :  { %v725_v12 = vadd.f32 %v724_v10, %v710_v5 }
 0x179   :  { %v726_v13 = vadd.f32 %v725_v12, %v711_v8 }
 0x17b   :  { %v727_v16 = vrot.slane %v726_v13, 4 }
 0x17d   :  { %v728_v14 = vadd.f32 %v727_v16, %v726_v13 }
 0x17f   :  { %v729_v11 = vrot.slane %v728_v14, 2 }
 0x181   :  { %v730_v17 = vadd.f32 %v729_v11, %v728_v14 }
 0x183   :  { %v731_v18 = vrot.slane %v730_v17, 1 }
 0x185   :  { %v732_v19 = vadd.f32 %v731_v18, %v730_v17 }
 0x187   :  { %v847_v20 = vmul.f32 -1.442695, %v732_v19 }
 0x189   :  { %1133 = vpow2.f32 %v847_v20 }
 0x193   :  { %v1134_v21 = vpop.eup %1133 }
 0x194   :  { %v736_v22 = vadd.f32 1.0, %v1134_v21 }
 0x196   :  { %1135 = vrcp.f32 %v736_v22 }
 0x1a0   :  { %v1136_v24 = vpop.eup %1135 }
 0x1a1   :  { %v743_v26 = vsub.f32 1.0, %v1136_v24  ;;  %v741_v27 = vmul.f32 %v1136_v24, %v739_v15 }
 0x1a3   :  { %v744_v28 = vmul.f32 %v743_v26, %v742_v23  ;;  %s1089_s5 = spop %1088 }
 0x1a4   :  { %s263_s4 = smul.f32 -0.001953125, %s1089_s5 }
 0x1a5   :  { %v745_v29 = vadd.f32 %v744_v28, %v741_v27 }
 0x1a6   :  { %v264_v51 = vstv %s263_s4 }
 0x1a7   :  { %v746_v30 = vadd.f32 1e-15, %v745_v29 }
 0x1a9   :  { %1137 = vlog2.f32 %v746_v30 }
 0x1b3   :  { %v1138_v32 = vpop.eup %1137 }
 0x1b4   :  { %v748_v25 = vmul.f32 0.6931472, %v1138_v32 }
 0x1b6   :  { %v749_v34 = vsub.f32 0.0, %v748_v25 }
 0x1b8   :  { %v750_v35 = vmul.f32 %v749_v34, %v740_v33 }
 0x1ba   :  { %v752_v36 = vsel %vm751_vm0, %v750_v35, 0.0 }
 0x1bb   :  { %753 = vadd.xlane.f32.xlu0 %v752_v36 }
 0x248   :  { %v754_v44 = vpop.xlane.xlu0 %753 }
 0x249   :  { %v755_v45 = vrot.slane %v754_v44, 4 }
 0x24b   :  { %v756_v46 = vadd.f32 %v755_v45, %v754_v44 }
 0x24d   :  { %v757_v47 = vrot.slane %v756_v46, 2 }
 0x24f   :  { %v758_v41 = vadd.f32 %v757_v47, %v756_v46 }
 0x251   :  { %v759_v48 = vrot.slane %v758_v41, 1 }
 0x253   :  { %v760_v50 = vadd.f32 %v759_v48, %v758_v41 }
 0x255   :  { %1090 = vpush %v760_v50 }
 0x286   :  { %s1091_s18 = spop %1090 }
 0x287   :  { %v763_v52 = vstv %s1091_s18 }
 0x288   :  { %v764_v53 = vadd.f32 %v763_v52, %v264_v51 }
 0x28a   :  { %765 = vst [vmem:[#allocation11] sm:$0xff] %v764_v53 }
 0x28b   :  { %1260 = shalt.err (!%p1257_p2)
}
 0x28c   :  { %s1261_s22 = scalar_lea.hbm %s1615_s7, 128 }
 0x28d   :  { %p1262_p3 = scmp.ne.s32.totalorder %s1615_s7, %s1261_s22  ;;  %p1265_p4 = scmp.lt.u32.totalorder %s1261_s22, %s1615_s7 }
 0x28f   :  { %p1267_p5 = pnand %p1265_p4, %p1262_p3 }
 0x291   :  { %1270 = shalt.err (!%p1267_p5)
}
 0x292   :  { %775 = dma.vmem_to_hbm [thread:$0]  %s773_s17, 128, %s1615_s7, [#allocation4]  }
 0x293   :  { %1277 = dma.done.wait [#allocation4], 128  }
 0x294   :  { %1278 = vsyncadd [#allocation4], 4294967168 }
 0x295   :  { %779 = vsyncpa [#allocation3], 1 }
 0x296   :  { %780 = vsyncpa [#allocation6], 1 }
 0x297   :  { %781 = vsyncpa [#allocation9], 1 }
 0x298   :  { %782 = vsyncpa [#allocation4], 1 }

</bundles_post_ra>
